<compile_context>
chip_gen: v6e
topology: v6e:2x2x1
jax: 0.10.0
libtpu: 0.0.40
codegen_flags: <defaults>
</compile_context>

<pallas_src>
import functools
import math

import jax
import jax.numpy as jnp
from jax.experimental import pallas as pl
from jax.experimental.pallas import tpu as pltpu


# ---------------------------------------------------------------------------
# helpers
# ---------------------------------------------------------------------------
def _round_up(n, m):
    return ((n + m - 1) // m) * m


def build_params(input_size, num_hidden_layer, output_size, key):
    """Deterministic parameter init mirroring the module's layer-size schedule.

    Returns list of (w, b) with w shaped (F_in, F_out)  [= PyTorch W^T].
    Uses PyTorch nn.Linear default init: U(-1/sqrt(fan_in), 1/sqrt(fan_in)).
    """
    diff = int((input_size - output_size) / (num_hidden_layer + 1))
    sizes = []
    l = input_size - diff
    sizes.append((input_size, max(1, l)))                      # input_layer
    for _ in range(num_hidden_layer):
        sizes.append((max(1, l), max(1, l - diff)))            # hidden_k
        l -= diff
    sizes.append((max(1, l), output_size))                     # output_layer

    params = []
    for (fan_in, fan_out) in sizes:
        key, kw, kb = jax.random.split(key, 3)
        bound = 1.0 / math.sqrt(fan_in)
        w = jax.random.uniform(kw, (fan_in, fan_out), jnp.float32, -bound, bound)
        b = jax.random.uniform(kb, (fan_out,), jnp.float32, -bound, bound)
        params.append((w, b))
    return params


def prepare_params(params):
    """One-time preprocessing (hoisted out of the forward, per perf review).

    Pads every weight to (128k_in, 128k_out) directly in bf16 and every bias to
    (1, 128k_out) in f32.  Returns (flat_params, dims_p, out_size) where
    flat_params = (w0, b0, w1, b1, ...) and dims_p are the padded feature dims.
    """
    dims = [params[0][0].shape[0]] + [w.shape[1] for (w, _) in params]
    dims_p = tuple(_round_up(d, 128) for d in dims)

    flat = []
    for li, (w, b) in enumerate(params):
        fi, fo = w.shape
        fip, fop = dims_p[li], dims_p[li + 1]
        # Pad in the target dtype — no f32 (fip, fop) intermediate.
        w_pad = jnp.pad(w.astype(jnp.bfloat16), ((0, fip - fi), (0, fop - fo)))
        b_pad = jnp.pad(b.astype(jnp.float32)[None, :], ((0, 0), (0, fop - fo)))
        flat += [w_pad, b_pad]
    out_size = params[-1][0].shape[1]
    return tuple(flat), dims_p, out_size


# ---------------------------------------------------------------------------
# fused kernel
# ---------------------------------------------------------------------------
def _fused_mlp_kernel(*refs):
    """Refs layout: (x, w0, b0, w1, b1, ..., w{n-1}, b{n-1}, out).

    Unrolled layer chain: the activation lives in vregs/VMEM for the whole
    network; only x, the weights and the final output touch HBM.
    """
    n_layers = (len(refs) - 2) // 2
    x_ref = refs[0]
    o_ref = refs[-1]

    h = x_ref[...]                                       # bf16 (Bp, F0p)
    for k in range(n_layers):
        w = refs[1 + 2 * k][...]                         # bf16 (Fkp, Fk+1p)
        b = refs[2 + 2 * k][...]                         # f32  (1, Fk+1p)
        # MXU: bf16 operands, f32 accumulation.
        y = jnp.dot(h, w, preferred_element_type=jnp.float32)
        # Elementwise in f32 (v5e has no bf16 VPU; free on v6e/v7x).
        y = jnp.maximum(y + b, 0.0)
        if k + 1 < n_layers:
            h = y.astype(jnp.bfloat16)                   # feed next MXU in bf16
        else:
            h = y                                        # final output stays f32
    o_ref[...] = h


# ---------------------------------------------------------------------------
# forward
# ---------------------------------------------------------------------------
@functools.partial(jax.jit, static_argnums=(2, 3))
def mtg_deck_builder_forward(x, flat_params, dims_p, out_size):
    """flatten -> (linear + relu) for every layer — one fused pallas_call."""
    B = x.shape[0]
    h = x.reshape(B, -1)
    in_size = h.shape[1]
    n_layers = len(flat_params) // 2

    # bf16 vreg packs (16, 128): pad batch to 16 sublanes, features to 128 lanes.
    Bp = _round_up(max(B, 1), 16)
    out_p = dims_p[-1]

    # Cast first, then pad — single bf16 intermediate (no f32 pad buffer).
    x_pad = jnp.pad(h.astype(jnp.bfloat16),
                    ((0, Bp - B), (0, dims_p[0] - in_size)))

    in_specs = [pl.BlockSpec((Bp, dims_p[0]), lambda: (0, 0))]
    flops = 0
    bytes_accessed = x_pad.size * 2
    weight_bytes = 0
    for k in range(n_layers):
        fip, fop = dims_p[k], dims_p[k + 1]
        in_specs += [
            pl.BlockSpec((fip, fop), lambda: (0, 0)),
            pl.BlockSpec((1, fop), lambda: (0, 0)),
        ]
        flops += 2 * Bp * fip * fop
        weight_bytes += fip * fop * 2 + fop * 4
    bytes_accessed += weight_bytes + Bp * out_p * 4

    # Everything is VMEM-resident (no grid → no double buffering).  Size the
    # scoped-VMEM limit explicitly with 2x headroom — matters for v5e's 16 MiB
    # default; capped at 64 MiB so it never exceeds v7x physical VMEM.
    resident = x_pad.size * 2 + weight_bytes + Bp * out_p * 4
    vmem_limit = int(min(64 << 20, max(16 << 20, 2 * resident)))

    out = pl.pallas_call(
        _fused_mlp_kernel,
        out_shape=jax.ShapeDtypeStruct((Bp, out_p), jnp.float32),
        in_specs=in_specs,
        out_specs=pl.BlockSpec((Bp, out_p), lambda: (0, 0)),
        compiler_params=pltpu.CompilerParams(vmem_limit_bytes=vmem_limit),
        cost_estimate=pl.CostEstimate(
            flops=flops, transcendentals=0, bytes_accessed=bytes_accessed),
    )(x_pad, *flat_params)

    # Slice padding back off.
    return out[:B, :out_size]


# ---------------------------------------------------------------------------
# demo
# ---------------------------------------------------------------------------
if __name__ == "__main__":
    # Small synthetic config:
    #   input x: (batch=2, 8, 8)  -> flattened input_size = 64
    #   num_hidden_layer = 2, output_size = 16
    #   layer sizes: 64 -> 48 -> 32 -> 16 -> 16
    # NOTE: for throughput, batch many decks per call (>=128 rows on v5e,
    # >=256 on v6e/v7x) — the fused kernel handles any B; demo stays tiny.
    input_size = 64
    num_hidden_layer = 2
    output_size = 16

    key = jax.random.PRNGKey(0)
    key, kx = jax.random.split(key)
    x = jax.random.normal(kx, (2, 8, 8), dtype=jnp.float32)

    params = build_params(input_size, num_hidden_layer, output_size, key)
    flat_params, dims_p, out_size = prepare_params(params)       # one-time hoist

    out = mtg_deck_builder_forward(x, flat_params, dims_p, out_size)
    out = jax.block_until_ready(out)
    assert out.shape == (2, output_size), out.shape
    assert bool(jnp.all(out >= 0.0))  # ReLU applied to every layer's output

    # Cross-check against a pure-JAX reference (bf16 matmul, f32 accumulate).
    ref = x.reshape(2, -1).astype(jnp.float32)
    for (w, b) in params:
        ref = jnp.maximum(
            jnp.dot(ref.astype(jnp.bfloat16), w.astype(jnp.bfloat16),
                    preferred_element_type=jnp.float32) + b, 0.0)
    assert bool(jnp.allclose(out, ref, atol=1e-2, rtol=1e-2))

    print("KERNEL_OK")
</pallas_src>

<mosaic_0001>
module attributes {stable_mosaic.version = 11 : i64} {
  func.func @_fused_mlp_kernel(%arg0: memref<16x128xbf16, #tpu.memory_space<vmem>>, %arg1: memref<128x128xbf16, #tpu.memory_space<vmem>>, %arg2: memref<1x128xf32, #tpu.memory_space<vmem>>, %arg3: memref<128x128xbf16, #tpu.memory_space<vmem>>, %arg4: memref<1x128xf32, #tpu.memory_space<vmem>>, %arg5: memref<128x128xbf16, #tpu.memory_space<vmem>>, %arg6: memref<1x128xf32, #tpu.memory_space<vmem>>, %arg7: memref<128x128xbf16, #tpu.memory_space<vmem>>, %arg8: memref<1x128xf32, #tpu.memory_space<vmem>>, %arg9: memref<16x128xf32, #tpu.memory_space<vmem>>) attributes {dimension_semantics = [], scalar_prefetch = 0 : i64, scratch_operands = 0 : i64, tpu.core_type = #tpu.core_type<tc>} {
    %c0 = arith.constant 0 : index
    %c0_0 = arith.constant 0 : index
    %0 = vector.load %arg0[%c0, %c0_0] : memref<16x128xbf16, #tpu.memory_space<vmem>>, vector<16x128xbf16>
    %c0_1 = arith.constant 0 : index
    %c0_2 = arith.constant 0 : index
    %1 = vector.load %arg1[%c0_1, %c0_2] : memref<128x128xbf16, #tpu.memory_space<vmem>>, vector<128x128xbf16>
    %c0_3 = arith.constant 0 : index
    %c0_4 = arith.constant 0 : index
    %2 = vector.load %arg2[%c0_3, %c0_4] : memref<1x128xf32, #tpu.memory_space<vmem>>, vector<1x128xf32>
    %cst = arith.constant dense<0.000000e+00> : vector<16x128xf32>
    %3 = tpu.matmul %0, %1, %cst {dimension_numbers = #tpu.dot_dimension_numbers<[1], [0], [0], [1], [0, 0, 1, 1], [], []>} : vector<16x128xbf16>, vector<128x128xbf16>, vector<16x128xf32> -> vector<16x128xf32>
    %4 = vector.broadcast %2 : vector<1x128xf32> to vector<16x128xf32>
    %5 = arith.addf %3, %4 : vector<16x128xf32>
    %cst_5 = arith.constant 0.000000e+00 : f32
    %6 = vector.broadcast %cst_5 : f32 to vector<16x128xf32>
    %7 = arith.maximumf %5, %6 : vector<16x128xf32>
    %8 = arith.truncf %7 : vector<16x128xf32> to vector<16x128xbf16>
    %c0_6 = arith.constant 0 : index
    %c0_7 = arith.constant 0 : index
    %9 = vector.load %arg3[%c0_6, %c0_7] : memref<128x128xbf16, #tpu.memory_space<vmem>>, vector<128x128xbf16>
    %c0_8 = arith.constant 0 : index
    %c0_9 = arith.constant 0 : index
    %10 = vector.load %arg4[%c0_8, %c0_9] : memref<1x128xf32, #tpu.memory_space<vmem>>, vector<1x128xf32>
    %cst_10 = arith.constant dense<0.000000e+00> : vector<16x128xf32>
    %11 = tpu.matmul %8, %9, %cst_10 {dimension_numbers = #tpu.dot_dimension_numbers<[1], [0], [0], [1], [0, 0, 1, 1], [], []>} : vector<16x128xbf16>, vector<128x128xbf16>, vector<16x128xf32> -> vector<16x128xf32>
    %12 = vector.broadcast %10 : vector<1x128xf32> to vector<16x128xf32>
    %13 = arith.addf %11, %12 : vector<16x128xf32>
    %cst_11 = arith.constant 0.000000e+00 : f32
    %14 = vector.broadcast %cst_11 : f32 to vector<16x128xf32>
    %15 = arith.maximumf %13, %14 : vector<16x128xf32>
    %16 = arith.truncf %15 : vector<16x128xf32> to vector<16x128xbf16>
    %c0_12 = arith.constant 0 : index
    %c0_13 = arith.constant 0 : index
    %17 = vector.load %arg5[%c0_12, %c0_13] : memref<128x128xbf16, #tpu.memory_space<vmem>>, vector<128x128xbf16>
    %c0_14 = arith.constant 0 : index
    %c0_15 = arith.constant 0 : index
    %18 = vector.load %arg6[%c0_14, %c0_15] : memref<1x128xf32, #tpu.memory_space<vmem>>, vector<1x128xf32>
    %cst_16 = arith.constant dense<0.000000e+00> : vector<16x128xf32>
    %19 = tpu.matmul %16, %17, %cst_16 {dimension_numbers = #tpu.dot_dimension_numbers<[1], [0], [0], [1], [0, 0, 1, 1], [], []>} : vector<16x128xbf16>, vector<128x128xbf16>, vector<16x128xf32> -> vector<16x128xf32>
    %20 = vector.broadcast %18 : vector<1x128xf32> to vector<16x128xf32>
    %21 = arith.addf %19, %20 : vector<16x128xf32>
    %cst_17 = arith.constant 0.000000e+00 : f32
    %22 = vector.broadcast %cst_17 : f32 to vector<16x128xf32>
    %23 = arith.maximumf %21, %22 : vector<16x128xf32>
    %24 = arith.truncf %23 : vector<16x128xf32> to vector<16x128xbf16>
    %c0_18 = arith.constant 0 : index
    %c0_19 = arith.constant 0 : index
    %25 = vector.load %arg7[%c0_18, %c0_19] : memref<128x128xbf16, #tpu.memory_space<vmem>>, vector<128x128xbf16>
    %c0_20 = arith.constant 0 : index
    %c0_21 = arith.constant 0 : index
    %26 = vector.load %arg8[%c0_20, %c0_21] : memref<1x128xf32, #tpu.memory_space<vmem>>, vector<1x128xf32>
    %cst_22 = arith.constant dense<0.000000e+00> : vector<16x128xf32>
    %27 = tpu.matmul %24, %25, %cst_22 {dimension_numbers = #tpu.dot_dimension_numbers<[1], [0], [0], [1], [0, 0, 1, 1], [], []>} : vector<16x128xbf16>, vector<128x128xbf16>, vector<16x128xf32> -> vector<16x128xf32>
    %28 = vector.broadcast %26 : vector<1x128xf32> to vector<16x128xf32>
    %29 = arith.addf %27, %28 : vector<16x128xf32>
    %cst_23 = arith.constant 0.000000e+00 : f32
    %30 = vector.broadcast %cst_23 : f32 to vector<16x128xf32>
    %31 = arith.maximumf %29, %30 : vector<16x128xf32>
    %c0_24 = arith.constant 0 : index
    %c0_25 = arith.constant 0 : index
    %32 = vector.load %arg9[%c0_24, %c0_25] : memref<16x128xf32, #tpu.memory_space<vmem>>, vector<16x128xf32>
    tpu.vector_store %arg9[%c0_24, %c0_25], %31 {strides = array<i32>} : memref<16x128xf32, #tpu.memory_space<vmem>>, vector<16x128xf32>,
    return
  }
}

</mosaic_0001>

<bundles_post_ra>
// kernel: mtg_deck_builder_forward.1
= control target key start
LH: loop header
LB: loop body
LE: loop exit
PB: predicated region body
PF: predicated region fallthrough
CT: control target
= control target key end

     0   :  { %14 = vsyncpa [#allocation3], 0  ;;  %s987_s0 = inlined_call_operand.vmem [shape: bf16[16,128], index: 0, kind: input, shape index: {}]   ;;  %s988_s1 = inlined_call_operand.hbm [shape: bf16[128,128], index: 1, kind: input, shape index: {}]   ;;  %s989_s2 = inlined_call_operand.vmem [shape: f32[1,128], index: 2, kind: input, shape index: {}]   ;;  %s990_s3 = inlined_call_operand.hbm [shape: bf16[128,128], index: 3, kind: input, shape index: {}]   ;;  %s991_s4 = inlined_call_operand.vmem [shape: f32[1,128], index: 4, kind: input, shape index: {}]   ;;  %s992_s5 = inlined_call_operand.hbm [shape: bf16[128,128], index: 5, kind: input, shape index: {}]   ;;  %s993_s6 = inlined_call_operand.vmem [shape: f32[1,128], index: 6, kind: input, shape index: {}]   ;;  %s994_s7 = inlined_call_operand.hbm [shape: bf16[128,128], index: 7, kind: input, shape index: {}]   ;;  %s995_s8 = inlined_call_operand.vmem [shape: f32[1,128], index: 8, kind: input, shape index: {}]   ;;  %s996_s9 = inlined_call_operand.vmem [shape: f32[16,128], index: 9, kind: output, shape index: {}]  }
   0x1   :  { %15 = vsyncpa [#allocation5], 0 }
   0x2   :  { %16 = vsyncpa [#allocation8], 0  ;;  %s844_s30 = smov [#allocation4]   ;;  %s845_s11 = smov [#allocation2]  }
   0x3   :  { %s38_s10 = sshll.u32 %s844_s30, 4  ;;  %s24_s12 = sshll.u32 %s845_s11, 4  ;;  %s39_s10 = int_to_ptr.vmem [resolvable:$true] %s38_s10  ;;  %s25_s12 = int_to_ptr.vmem [resolvable:$true] %s24_s12 }
   0x4   :  { %s766_s13 = scalar_lea.vmem %s39_s10, 1024  ;;  %p771_p1 = scmp.lt.s32.totalorder %s39_s10, %s39_s10 }
   0x5   :  { %p767_p0 = scmp.ne.s32.totalorder %s39_s10, %s766_s13  ;;  %p772_p2 = scmp.lt.s32.totalorder %s766_s13, %s766_s13 }
   0x7   :  { %p773_p3 = por %p772_p2, %p771_p1 }
   0x9   :  { %p774_p4 = pnand %p773_p3, %p767_p0 }
   0xb   :  { %777 = shalt.err (!%p774_p4)
}
   0xc   :  { %s846_s14 = smov 64   ;;  %s847_s15 = smov 4  }
   0xd   :  { %44 = dma.hbm_to_vmem [thread:$0]  %s990_s3, 1024, %s39_s10, [#allocation5], %s846_s14, %s846_s14, %s847_s15  }
   0xe   :  { %s786_s18 = scalar_lea.vmem %s25_s12, 1024  ;;  %p791_p6 = scmp.lt.s32.totalorder %s25_s12, %s25_s12 }
   0xf   :  { %p787_p5 = scmp.ne.s32.totalorder %s25_s12, %s786_s18  ;;  %p792_p7 = scmp.lt.s32.totalorder %s786_s18, %s786_s18 }
  0x11   :  { %p793_p8 = por %p792_p7, %p791_p6 }
  0x13   :  { %p794_p9 = pnand %p793_p8, %p787_p5 }
  0x15   :  { %797 = shalt.err (!%p794_p9)
}
  0x16   :  { %30 = dma.hbm_to_vmem [thread:$0]  %s988_s1, 1024, %s25_s12, [#allocation3], %s846_s14, %s846_s14, %s847_s15  }
  0x17   :  { %s848_s21 = smov [#allocation6]   ;;  %s849_s23 = smov [#allocation7]  }
  0x18   :  { %s52_s22 = sshll.u32 %s848_s21, 4  ;;  %s66_s24 = sshll.u32 %s849_s23, 4  ;;  %s53_s22 = int_to_ptr.vmem [resolvable:$true] %s52_s22  ;;  %s67_s24 = int_to_ptr.vmem [resolvable:$true] %s66_s24 }
  0x19   :  { %s806_s3 = scalar_lea.vmem %s53_s22, 1024  ;;  %p811_p11 = scmp.lt.s32.totalorder %s53_s22, %s53_s22 }
  0x1a   :  { %p807_p10 = scmp.ne.s32.totalorder %s53_s22, %s806_s3  ;;  %p812_p12 = scmp.lt.s32.totalorder %s806_s3, %s806_s3 }
  0x1c   :  { %p813_p13 = por %p812_p12, %p811_p11 }
  0x1e   :  { %p814_p0 = pnand %p813_p13, %p807_p10 }
  0x20   :  { %817 = shalt.err (!%p814_p0)
}
  0x21   :  { %58 = dma.hbm_to_vmem [thread:$0]  %s992_s5, 1024, %s53_s22, [#allocation5], %s846_s14, %s846_s14, %s847_s15  }
  0x22   :  { %s826_s1 = scalar_lea.vmem %s67_s24, 1024  ;;  %p831_p2 = scmp.lt.s32.totalorder %s67_s24, %s67_s24 }
  0x23   :  { %p827_p1 = scmp.ne.s32.totalorder %s67_s24, %s826_s1  ;;  %p832_p3 = scmp.lt.s32.totalorder %s826_s1, %s826_s1 }
  0x25   :  { %p833_p4 = por %p832_p3, %p831_p2 }
  0x27   :  { %p834_p5 = pnand %p833_p4, %p827_p1 }
  0x29   :  { %837 = shalt.err (!%p834_p5)
}
  0x2a   :  { %72 = dma.hbm_to_vmem [thread:$0]  %s994_s7, 1024, %s67_s24, [#allocation8], %s846_s14, %s846_s14, %s847_s15  }
  0x2b   :  { %838 = dma.done.wait [#allocation3], 1024  }
  0x2c   :  { %839 = vsyncadd [#allocation3], 4294966272 }
  0x2d   :  { %840 = dma.done.wait [#allocation5], 2048  }
  0x2e   :  { %841 = vsyncadd [#allocation5], 4294965248 }
  0x2f   :  { %842 = dma.done.wait [#allocation8], 1024  }
  0x30   :  { %843 = vsyncadd [#allocation8], 4294966272  ;;  %v850_v0 = vmov 0.0   ;;  %vm851_vm0 = vmmov 0   ;;  %v725_v1 = vld [vmem:[#allocation2 + $0x38] sm:$0xff]   ;;  %v726_v2 = vld [vmem:[#allocation2 + $0x30] sm:$0xff]  }
  0x31   :  { %637 = vmatprep.subr.bf16.mxu0 %v850_v0  ;;  %653 = vmatprep.mubr.msk.bf16.mxu0 %vm851_vm0, %v850_v0  ;;  %v727_v3 = vld [vmem:[#allocation2 + $0x28] sm:$0xff]   ;;  %v734_v4 = vld [vmem:[#allocation4 + $0x38] sm:$0xff]   ;;  %v728_v5 = vld [vmem:[#allocation2 + $0x20] sm:$0xff]  }
  0x32   :  { %657 = vmatprep.subr.bf16.mxu1 %v850_v0  ;;  %673 = vmatprep.mubr.msk.bf16.mxu1 %vm851_vm0, %v850_v0  ;;  %v735_v6 = vld [vmem:[#allocation4 + $0x30] sm:$0xff]   ;;  %v729_v7 = vld [vmem:[#allocation2 + $0x18] sm:$0xff]   ;;  %v736_v8 = vld [vmem:[#allocation4 + $0x28] sm:$0xff]  }
  0x33   :  { %638 = vmatpush3.bf16.msra.mxu0 %v725_v1  ;;  %658 = vmatpush3.bf16.msra.mxu1 %v734_v4  ;;  %v730_v9 = vld [vmem:[#allocation2 + $0x10] sm:$0xff]   ;;  %v737_v10 = vld [vmem:[#allocation4 + $0x20] sm:$0xff]   ;;  %v731_v11 = vld [vmem:[#allocation2 + $0x8] sm:$0xff]  }
  0x34   :  { %639 = vmatprep.subr.bf16.mxu0 %v850_v0  ;;  %659 = vmatprep.subr.bf16.mxu1 %v850_v0  ;;  %v738_v12 = vld [vmem:[#allocation4 + $0x18] sm:$0xff]   ;;  %v732_v13 = vld [vmem:[#allocation2] sm:$0xff]   ;;  %v739_v15 = vld [vmem:[#allocation4 + $0x10] sm:$0xff]  }
  0x35   :  { %v733_v14 = vld [vmem:[%s987_s0] sm:$0xff]   ;;  %v740_v16 = vld [vmem:[#allocation4 + $0x8] sm:$0xff]   ;;  %v742_v18 = vld [vmem:[#allocation6 + $0x38] sm:$0xff]  }
  0x36   :  { %v741_v17 = vld [vmem:[#allocation4] sm:$0xff]   ;;  %v743_v19 = vld [vmem:[#allocation6 + $0x30] sm:$0xff]   ;;  %v744_v20 = vld [vmem:[#allocation6 + $0x28] sm:$0xff]  }
  0x37   :  { %640 = vmatpush3.bf16.msra.mxu0 %v726_v2  ;;  %660 = vmatpush3.bf16.msra.mxu1 %v735_v6  ;;  %v745_v21 = vld [vmem:[#allocation6 + $0x20] sm:$0xff]   ;;  %v746_v22 = vld [vmem:[#allocation6 + $0x18] sm:$0xff]   ;;  %v747_v33 = vld [vmem:[#allocation6 + $0x10] sm:$0xff]  }
  0x38   :  { %641 = vmatprep.subr.bf16.mxu0 %v850_v0  ;;  %661 = vmatprep.subr.bf16.mxu1 %v850_v0  ;;  %v564_v23 = vld [vmem:[%s989_s2] ss:$0 sm:$0xff]  ;;  %v748_v34 = vld [vmem:[#allocation6 + $0x8] sm:$0xff]   ;;  %v750_v36 = vld [vmem:[#allocation7 + $0x38] sm:$0xff]  }
  0x39   :  { %v749_v35 = vld [vmem:[#allocation6] sm:$0xff]   ;;  %v751_v37 = vld [vmem:[#allocation7 + $0x30] sm:$0xff]   ;;  %v752_v38 = vld [vmem:[#allocation7 + $0x28] sm:$0xff]  }
  0x3a   :  { %v753_v39 = vld [vmem:[#allocation7 + $0x20] sm:$0xff]   ;;  %v754_v40 = vld [vmem:[#allocation7 + $0x18] sm:$0xff]   ;;  %v755_v51 = vld [vmem:[#allocation7 + $0x10] sm:$0xff]  }
  0x3b   :  { %642 = vmatpush3.bf16.msra.mxu0 %v727_v3  ;;  %662 = vmatpush3.bf16.msra.mxu1 %v736_v8  ;;  %v574_v41 = vld [vmem:[%s991_s4] ss:$0 sm:$0xff]  ;;  %v756_v52 = vld [vmem:[#allocation7 + $0x8] sm:$0xff]  }
  0x3c   :  { %643 = vmatprep.subr.bf16.mxu0 %v850_v0  ;;  %663 = vmatprep.subr.bf16.mxu1 %v850_v0  ;;  %v757_v53 = vld [vmem:[#allocation7] sm:$0xff]  }
  0x3d   :  { %v583_v54 = vld [vmem:[%s993_s6] ss:$0 sm:$0xff] }
  0x3f   :  { %644 = vmatpush3.bf16.msra.mxu0 %v728_v5  ;;  %664 = vmatpush3.bf16.msra.mxu1 %v737_v10 }
  0x40   :  { %645 = vmatprep.subr.bf16.mxu0 %v850_v0  ;;  %665 = vmatprep.subr.bf16.mxu1 %v850_v0 }
  0x43   :  { %646 = vmatpush3.bf16.msra.mxu0 %v729_v7  ;;  %666 = vmatpush3.bf16.msra.mxu1 %v738_v12 }
  0x44   :  { %647 = vmatprep.subr.bf16.mxu0 %v850_v0  ;;  %667 = vmatprep.subr.bf16.mxu1 %v850_v0 }
  0x47   :  { %648 = vmatpush3.bf16.msra.mxu0 %v730_v9  ;;  %668 = vmatpush3.bf16.msra.mxu1 %v739_v15 }
  0x48   :  { %649 = vmatprep.subr.bf16.mxu0 %v850_v0  ;;  %669 = vmatprep.subr.bf16.mxu1 %v850_v0 }
  0x4b   :  { %650 = vmatpush3.bf16.msra.mxu0 %v731_v11  ;;  %670 = vmatpush3.bf16.msra.mxu1 %v740_v16 }
  0x4c   :  { %651 = vmatprep.subr.bf16.mxu0 %v850_v0  ;;  %671 = vmatprep.subr.bf16.mxu1 %v850_v0 }
  0x4f   :  { %652 = vmatpush3.bf16.msra.mxu0 %v732_v13  ;;  %672 = vmatpush3.bf16.msra.mxu1 %v741_v17 }
  0x50   :  { %677 = vmatprep.subr.bf16.mxu0 %v850_v0  ;;  %697 = vmatprep.subr.bf16.mxu1 %v850_v0 }
  0x52   :  { %654 = vmatmul.mubr.bf16.vlgmr.msra.gmra.mxu0 %v733_v14 }
  0x53   :  { %693 = vmatprep.mubr.msk.bf16.mxu0 %vm851_vm0, %v850_v0  ;;  %678 = vmatpush3.bf16.msra.mxu0 %v742_v18 }
  0x54   :  { %679 = vmatprep.subr.bf16.mxu0 %v850_v0 }
  0x57   :  { %680 = vmatpush3.bf16.msra.mxu0 %v743_v19 }
  0x58   :  { %681 = vmatprep.subr.bf16.mxu0 %v850_v0 }
  0x5b   :  { %682 = vmatpush3.bf16.msra.mxu0 %v744_v20 }
  0x5c   :  { %683 = vmatprep.subr.bf16.mxu0 %v850_v0 }
  0x5f   :  { %684 = vmatpush3.bf16.msra.mxu0 %v745_v21 }
  0x60   :  { %685 = vmatprep.subr.bf16.mxu0 %v850_v0 }
  0x63   :  { %686 = vmatpush3.bf16.msra.mxu0 %v746_v22 }
  0x64   :  { %687 = vmatprep.subr.bf16.mxu0 %v850_v0 }
  0x67   :  { %688 = vmatpush3.bf16.msra.mxu0 %v747_v33 }
  0x68   :  { %689 = vmatprep.subr.bf16.mxu0 %v850_v0 }
  0x6b   :  { %690 = vmatpush3.bf16.msra.mxu0 %v748_v34 }
  0x6c   :  { %691 = vmatprep.subr.bf16.mxu0 %v850_v0 }
  0x6f   :  { %692 = vmatpush3.bf16.msra.mxu0 %v749_v35 }
 0x112   :  { %v201_v24 = vpop.f32.mrf.mxu0 }
 0x113   :  { %v202_v26 = vadd.f32 %v564_v23, %v201_v24 }
 0x114   :  { %v655_v25 = vpop.f32.mrf.mxu0 }
 0x115   :  { %v208_v30 = vmax.f32 %v202_v26, 0.0 }
 0x116   :  { %v204_v27 = vpop.f32.mrf.mxu0 }
 0x117   :  { %v205_v28 = vadd.f32 %v564_v23, %v204_v27 }
 0x118   :  { %v656_v29 = vpop.f32.mrf.mxu0 }
 0x119   :  { %v209_v31 = vmax.f32 %v205_v28, 0.0 }
 0x11b   :  { %v210_v32 = vpack.c.bf16 %v209_v31, %v208_v30 }
 0x11d   :  { %674 = vmatmul.mubr.bf16.vlgmr.msra.gmra.mxu1 %v210_v32 }
 0x11e   :  { %713 = vmatprep.mubr.msk.bf16.mxu1 %vm851_vm0, %v850_v0  ;;  %698 = vmatpush3.bf16.msra.mxu1 %v750_v36 }
 0x11f   :  { %699 = vmatprep.subr.bf16.mxu1 %v850_v0 }
 0x122   :  { %700 = vmatpush3.bf16.msra.mxu1 %v751_v37 }
 0x123   :  { %701 = vmatprep.subr.bf16.mxu1 %v850_v0 }
 0x126   :  { %702 = vmatpush3.bf16.msra.mxu1 %v752_v38 }
 0x127   :  { %703 = vmatprep.subr.bf16.mxu1 %v850_v0 }
 0x12a   :  { %704 = vmatpush3.bf16.msra.mxu1 %v753_v39 }
 0x12b   :  { %705 = vmatprep.subr.bf16.mxu1 %v850_v0 }
 0x12e   :  { %706 = vmatpush3.bf16.msra.mxu1 %v754_v40 }
 0x12f   :  { %707 = vmatprep.subr.bf16.mxu1 %v850_v0 }
 0x132   :  { %708 = vmatpush3.bf16.msra.mxu1 %v755_v51 }
 0x133   :  { %709 = vmatprep.subr.bf16.mxu1 %v850_v0 }
 0x136   :  { %710 = vmatpush3.bf16.msra.mxu1 %v756_v52 }
 0x137   :  { %711 = vmatprep.subr.bf16.mxu1 %v850_v0  ;;  %v592_v0 = vld [vmem:[%s995_s8] ss:$0 sm:$0xff] }
 0x13a   :  { %712 = vmatpush3.bf16.msra.mxu1 %v757_v53 }
 0x1dd   :  { %v316_v42 = vpop.f32.mrf.mxu1 }
 0x1de   :  { %v317_v44 = vadd.f32 %v574_v41, %v316_v42 }
 0x1df   :  { %v675_v43 = vpop.f32.mrf.mxu1 }
 0x1e0   :  { %v323_v48 = vmax.f32 %v317_v44, 0.0 }
 0x1e1   :  { %v319_v45 = vpop.f32.mrf.mxu1 }
 0x1e2   :  { %v320_v46 = vadd.f32 %v574_v41, %v319_v45 }
 0x1e3   :  { %v676_v47 = vpop.f32.mrf.mxu1 }
 0x1e4   :  { %v324_v49 = vmax.f32 %v320_v46, 0.0 }
 0x1e6   :  { %v325_v50 = vpack.c.bf16 %v324_v49, %v323_v48 }
 0x1e8   :  { %694 = vmatmul.mubr.bf16.vlgmr.msra.gmra.mxu0 %v325_v50 }
 0x2a8   :  { %v431_v55 = vpop.f32.mrf.mxu0 }
 0x2a9   :  { %v432_v57 = vadd.f32 %v583_v54, %v431_v55 }
 0x2aa   :  { %v695_v56 = vpop.f32.mrf.mxu0 }
 0x2ab   :  { %v438_v61 = vmax.f32 %v432_v57, 0.0 }
 0x2ac   :  { %v434_v58 = vpop.f32.mrf.mxu0 }
 0x2ad   :  { %v435_v59 = vadd.f32 %v583_v54, %v434_v58 }
 0x2ae   :  { %v696_v60 = vpop.f32.mrf.mxu0 }
 0x2af   :  { %v439_v62 = vmax.f32 %v435_v59, 0.0 }
 0x2b1   :  { %v440_v63 = vpack.c.bf16 %v439_v62, %v438_v61 }
 0x2b3   :  { %714 = vmatmul.mubr.bf16.vlgmr.msra.gmra.mxu1 %v440_v63 }
 0x373   :  { %v546_v1 = vpop.f32.mrf.mxu1 }
 0x374   :  { %v547_v2 = vadd.f32 %v592_v0, %v546_v1 }
 0x375   :  { %v715_v3 = vpop.f32.mrf.mxu1 }
 0x376   :  { %v553_v4 = vmax.f32 %v547_v2, 0.0 }
 0x377   :  { %v549_v5 = vpop.f32.mrf.mxu1 }
 0x378   :  { %555 = vst [vmem:[%s996_s9] sm:$0xff] %v553_v4  ;;  %v550_v6 = vadd.f32 %v592_v0, %v549_v5 }
 0x379   :  { %v716_v7 = vpop.f32.mrf.mxu1 }
 0x37a   :  { %v554_v8 = vmax.f32 %v550_v6, 0.0 }
 0x37c   :  { %556 = vst [vmem:[%s996_s9 + $0x8] sm:$0xff] %v554_v8 }
 0x37d   :  { %561 = vsyncpa [#allocation3], 1 }
 0x37e   :  { %562 = vsyncpa [#allocation5], 1 }
 0x37f   :  { %563 = vsyncpa [#allocation8], 1 }

</bundles_post_ra>
